<compile_context>
chip_gen: v7x
topology: tpu7x:2x2x1
jax: 0.10.0
libtpu: 0.0.40
codegen_flags: <defaults>
</compile_context>

<pallas_src>
import functools

import jax
import jax.numpy as jnp
import numpy as np
from jax import lax
from jax.experimental import pallas as pl
from jax.experimental.pallas import tpu as pltpu

_VMEM_LIMIT_BYTES = 64 * 1024 * 1024


def _pick_row_tile(n, target):
    """Largest multiple-of-8 divisor of n that is <= target, else full extent.

    Full extent is always layout-legal; the divisor search avoids the previous
    revision's silent fall-back to huge single tiles for N that *is* tileable.
    """
    if n <= target:
        return n
    t = (target // 8) * 8
    while t >= 8:
        if n % t == 0:
            return t
        t -= 8
    return n


def _pick_lane_tile(n, target):
    """Largest multiple-of-128 divisor of n that is <= target, else full extent."""
    if n <= target:
        return n
    t = (target // 128) * 128
    while t >= 128:
        if n % t == 0:
            return t
        t -= 128
    return n


# --------------------------------------------------------------------------- #
# Kernel 1: K / V projection (Q is fused into kernel 2).
# Two full-width matmuls written straight into their own lane-dense outputs.
# --------------------------------------------------------------------------- #
def _kv_proj_kernel(x_ref, wk_t_ref, wv_t_ref, k_ref, v_ref):
    # x_ref: (TN, C); wk_t_ref / wv_t_ref: (C, TC); k_ref / v_ref: (TN, TC).
    x = x_ref[...]
    k_ref[...] = jnp.dot(x, wk_t_ref[...],
                         preferred_element_type=jnp.float32).astype(k_ref.dtype)
    v_ref[...] = jnp.dot(x, wv_t_ref[...],
                         preferred_element_type=jnp.float32).astype(v_ref.dtype)


# --------------------------------------------------------------------------- #
# Kernel 2: fused Q projection + key-tiled (flash-style) masked attention
#           + output projection.
# --------------------------------------------------------------------------- #
def _attn_proj_kernel(unseen_ref, x_ref, wq_t_ref, k_ref, v_ref, wproj_t_ref,
                      bproj_ref, o_ref, q_scr, m_scr, l_scr, acc_scr,
                      *, num_heads, seq_len):
    # x_ref: (TQ, C) query-row tile of the input; wq_t_ref: (C, C) (scale folded);
    # k_ref / v_ref: (TK, C) key/value tiles; wproj_t_ref: (C, C); bproj_ref: (1, C);
    # scratch: q_scr (TQ, C) compute dtype, m_scr / l_scr (TQ, H) f32,
    #          acc_scr (TQ, C) f32.
    TQ, C = x_ref.shape
    TK = k_ref.shape[0]
    hd = C // num_heads
    iq = pl.program_id(1)
    ik = pl.program_id(2)
    nk = pl.num_programs(2)
    unseen = unseen_ref[0]

    # Per (batch, query-tile) init: project Q once (scale pre-folded into W_q^T)
    # and reset the online-softmax state.
    @pl.when(ik == 0)
    def _init():
        q = jnp.dot(x_ref[...], wq_t_ref[...], preferred_element_type=jnp.float32)
        q_scr[...] = q.astype(q_scr.dtype)
        m_scr[...] = jnp.full_like(m_scr, -jnp.inf)
        l_scr[...] = jnp.zeros_like(l_scr)
        acc_scr[...] = jnp.zeros_like(acc_scr)

    # MCC decoder mask for this (query-tile, key-tile) pair, shared by all heads.
    # Masked iff global_col >= N - unseen and global_row != global_col.  Use a large
    # *finite* negative bias so fully-masked key tiles cannot produce NaN in the
    # online softmax (their contribution is later rescaled to exactly zero).
    row = iq * TQ + lax.broadcasted_iota(jnp.int32, (TQ, 1), 0)   # (TQ, 1)
    col = ik * TK + lax.broadcasted_iota(jnp.int32, (1, TK), 1)   # (1, TK)
    masked = jnp.logical_and(col >= (seq_len - unseen), row != col)
    bias = jnp.where(masked, jnp.float32(-1e30), jnp.float32(0.0))

    # Per-head 2-D MXU matmuls with flash-style running max / denominator.
    # (Heads stay as an unrolled static loop; M=TQ is widened instead of batching
    #  heads into a 3-D dot to keep layouts MXU-native.)
    for h in range(num_heads):
        sl = slice(h * hd, (h + 1) * hd)
        qh = q_scr[:, sl]                       # (TQ, hd)  compute dtype
        kh = k_ref[:, sl]                       # (TK, hd)
        vh = v_ref[:, sl]                       # (TK, hd)

        s = lax.dot_general(qh, kh, (((1,), (1,)), ((), ())),
                            preferred_element_type=jnp.float32)   # (TQ, TK) f32
        s = s + bias

        m_prev = m_scr[:, h:h + 1]              # (TQ, 1)
        l_prev = l_scr[:, h:h + 1]
        m_new = jnp.maximum(m_prev, jnp.max(s, axis=-1, keepdims=True))
        alpha = jnp.exp(m_prev - m_new)
        p = jnp.exp(s - m_new)
        l_new = alpha * l_prev + jnp.sum(p, axis=-1, keepdims=True)

        ctx = jnp.dot(p.astype(vh.dtype), vh, preferred_element_type=jnp.float32)
        acc_scr[:, sl] = alpha * acc_scr[:, sl] + ctx
        m_scr[:, h:h + 1] = m_new
        l_scr[:, h:h + 1] = l_new

    # Last key tile: normalize each head's accumulator (exact divide), then a single
    # full-width (TQ,C)@(C,C) output projection + bias.
    @pl.when(ik == nk - 1)
    def _finalize():
        for h in range(num_heads):
            sl = slice(h * hd, (h + 1) * hd)
            acc_scr[:, sl] = acc_scr[:, sl] / l_scr[:, h:h + 1]
        y = jnp.dot(acc_scr[...].astype(wproj_t_ref.dtype), wproj_t_ref[...],
                    preferred_element_type=jnp.float32)
        o_ref[...] = (y + bproj_ref[...]).astype(o_ref.dtype)


# --------------------------------------------------------------------------- #
# Wrapper
# --------------------------------------------------------------------------- #
def mcc_decoder_attention(x, w_qkv, w_proj, b_proj, unseen_size, num_heads,
                          *, q_tile=256, k_tile=512, row_tile=256, col_tile=512,
                          compute_dtype=None):
    B, N, C = x.shape
    assert C % num_heads == 0, "dim should be divisible by num_heads"
    hd = C // num_heads
    scale = hd ** (-0.5)
    cdt = compute_dtype if compute_dtype is not None else x.dtype
    out_dtype = x.dtype

    # One-time wrapper-side weight prep (outside the hot kernels):
    #  * fold the attention scale into W_q,
    #  * pre-transpose so every in-kernel contraction is layout-native,
    #  * cast to the compute dtype (bf16 when requested; no in-kernel upcasts).
    xc = x.astype(cdt)
    wq_t = jnp.transpose(w_qkv[0:C] * scale).astype(cdt)      # (C, C), scale folded
    wk_t = jnp.transpose(w_qkv[C:2 * C]).astype(cdt)          # (C, C)
    wv_t = jnp.transpose(w_qkv[2 * C:3 * C]).astype(cdt)      # (C, C)
    wproj_t = jnp.transpose(w_proj).astype(cdt)               # (C, C)
    bproj2d = b_proj.reshape(1, C).astype(jnp.float32)

    tn = _pick_row_tile(N, row_tile)    # kernel-1 sequence tile
    tc = _pick_lane_tile(C, col_tile)   # kernel-1 output-column tile
    tq = _pick_row_tile(N, q_tile)      # kernel-2 query tile
    tk = _pick_row_tile(N, k_tile)      # kernel-2 key tile

    # ---- Kernel 1: K / V projection -> k, v each (B, N, C) ------------------ #
    # Column grid axis keeps the streamed weight block at (C, tc) even for large C
    # (the review's alternative to Buffered(1) on a constant (C, 3C) block).
    k, v = pl.pallas_call(
        _kv_proj_kernel,
        out_shape=(jax.ShapeDtypeStruct((B, N, C), cdt),
                   jax.ShapeDtypeStruct((B, N, C), cdt)),
        grid=(B, C // tc, N // tn),     # n innermost: weight blocks re-used across n
        in_specs=[
            pl.BlockSpec((None, tn, C), lambda b, c, n: (b, n, 0)),   # x rows
            pl.BlockSpec((C, tc), lambda b, c, n: (0, c)),            # W_k^T cols
            pl.BlockSpec((C, tc), lambda b, c, n: (0, c)),            # W_v^T cols
        ],
        out_specs=(
            pl.BlockSpec((None, tn, tc), lambda b, c, n: (b, n, c)),
            pl.BlockSpec((None, tn, tc), lambda b, c, n: (b, n, c)),
        ),
        compiler_params=pltpu.CompilerParams(
            dimension_semantics=("parallel", "parallel", "parallel"),
            vmem_limit_bytes=_VMEM_LIMIT_BYTES),
    )(xc, wk_t, wv_t)

    # ---- Kernel 2: fused Q proj + key-tiled masked attention + out proj ---- #
    unseen = jnp.asarray([unseen_size], dtype=jnp.int32)
    kernel2 = functools.partial(_attn_proj_kernel, num_heads=num_heads, seq_len=N)

    out = pl.pallas_call(
        kernel2,
        out_shape=jax.ShapeDtypeStruct((B, N, C), out_dtype),
        grid_spec=pltpu.PrefetchScalarGridSpec(
            num_scalar_prefetch=1,                     # unseen_size lands in SMEM
            grid=(B, N // tq, N // tk),
            in_specs=[
                pl.BlockSpec((None, tq, C), lambda b, iq, ik, u: (b, iq, 0)),  # x q-rows
                pl.BlockSpec((C, C), lambda b, iq, ik, u: (0, 0)),             # W_q^T
                pl.BlockSpec((None, tk, C), lambda b, iq, ik, u: (b, ik, 0)),  # k tile
                pl.BlockSpec((None, tk, C), lambda b, iq, ik, u: (b, ik, 0)),  # v tile
                pl.BlockSpec((C, C), lambda b, iq, ik, u: (0, 0)),             # W_proj^T
                pl.BlockSpec((1, C), lambda b, iq, ik, u: (0, 0)),             # b_proj
            ],
            out_specs=pl.BlockSpec((None, tq, C), lambda b, iq, ik, u: (b, iq, 0)),
            scratch_shapes=[
                pltpu.VMEM((tq, C), cdt),                   # cached Q projection
                pltpu.VMEM((tq, num_heads), jnp.float32),   # running max per head
                pltpu.VMEM((tq, num_heads), jnp.float32),   # running denominator
                pltpu.VMEM((tq, C), jnp.float32),           # context accumulator
            ],
        ),
        compiler_params=pltpu.CompilerParams(
            # Batch is the only parallel axis so the v7x megacore never duplicates
            # K/V HBM streams for the same batch; key axis is the reduction axis.
            dimension_semantics=("parallel", "arbitrary", "arbitrary"),
            vmem_limit_bytes=_VMEM_LIMIT_BYTES),
    )(unseen, xc, wq_t, k, v, wproj_t, bproj2d)

    return out


# --------------------------------------------------------------------------- #
# Pure-JAX reference mirroring the PyTorch forward exactly.
# --------------------------------------------------------------------------- #
def mcc_decoder_attention_ref(x, w_qkv, w_proj, b_proj, unseen_size, num_heads):
    B, N, C = x.shape
    hd = C // num_heads
    scale = hd ** (-0.5)
    qkv = x @ w_qkv.T
    qkv = qkv.reshape(B, N, 3, num_heads, hd).transpose(2, 0, 3, 1, 4)
    q, k, v = qkv[0], qkv[1], qkv[2]
    attn = jnp.einsum('bhqd,bhkd->bhqk', q, k) * scale
    mask = np.zeros((1, 1, N, N), dtype=np.float32)
    mask[:, :, :, N - unseen_size:] = -np.inf
    for i in range(unseen_size):
        mask[:, :, -(i + 1), -(i + 1)] = 0.0
    attn = attn + jnp.asarray(mask)
    attn = jax.nn.softmax(attn, axis=-1)
    out = jnp.einsum('bhqk,bhkd->bhqd', attn, v)
    out = out.transpose(0, 2, 1, 3).reshape(B, N, C)
    return out @ w_proj.T + b_proj


if __name__ == "__main__":
    # Small shapes consistent with the module: B=2, N=8 tokens, dim=32, 4 heads.
    B, N, C = 2, 8, 32
    num_heads = 4
    unseen_size = 3

    key = jax.random.PRNGKey(0)
    kx, kq, kp, kb = jax.random.split(key, 4)
    x = jax.random.normal(kx, (B, N, C), dtype=jnp.float32)
    w_qkv = jax.random.normal(kq, (3 * C, C), dtype=jnp.float32) * 0.05
    w_proj = jax.random.normal(kp, (C, C), dtype=jnp.float32) * 0.05
    b_proj = jax.random.normal(kb, (C,), dtype=jnp.float32) * 0.05

    out = mcc_decoder_attention(x, w_qkv, w_proj, b_proj, unseen_size, num_heads)
    out = jax.block_until_ready(out)

    ref = mcc_decoder_attention_ref(x, w_qkv, w_proj, b_proj, unseen_size, num_heads)
    np.testing.assert_allclose(np.asarray(out), np.asarray(ref), rtol=2e-3, atol=1e-3)

    print("KERNEL_OK")
</pallas_src>

<mosaic_0001>
module attributes {stable_mosaic.version = 11 : i64} {
  func.func @_kv_proj_kernel(%arg0: i32, %arg1: i32, %arg2: i32, %arg3: memref<1x8x32xf32, #tpu.memory_space<vmem>>, %arg4: memref<32x32xf32, #tpu.memory_space<vmem>>, %arg5: memref<32x32xf32, #tpu.memory_space<vmem>>, %arg6: memref<1x8x32xf32, #tpu.memory_space<vmem>>, %arg7: memref<1x8x32xf32, #tpu.memory_space<vmem>>) attributes {dimension_semantics = [#tpu.dimension_semantics<parallel>, #tpu.dimension_semantics<parallel>, #tpu.dimension_semantics<parallel>], iteration_bounds = array<i64: 2, 1, 1>, scalar_prefetch = 0 : i64, scratch_operands = 0 : i64, tpu.core_type = #tpu.core_type<tc>, window_params = [{transform_indices = @transform_0, window_bounds = array<i64: 1, 8, 32>}, {transform_indices = @transform_1, window_bounds = array<i64: 32, 32>}, {transform_indices = @transform_2, window_bounds = array<i64: 32, 32>}, {transform_indices = @transform_3, window_bounds = array<i64: 1, 8, 32>}, {transform_indices = @transform_4, window_bounds = array<i64: 1, 8, 32>}]} {
    %c0 = arith.constant 0 : index
    %c0_0 = arith.constant 0 : index
    %c0_1 = arith.constant 0 : index
    %0 = vector.load %arg3[%c0, %c0_0, %c0_1] : memref<1x8x32xf32, #tpu.memory_space<vmem>>, vector<1x8x32xf32>
    %1 = vector.shape_cast %0 : vector<1x8x32xf32> to vector<8x32xf32>
    %c0_2 = arith.constant 0 : index
    %c0_3 = arith.constant 0 : index
    %2 = vector.load %arg4[%c0_2, %c0_3] : memref<32x32xf32, #tpu.memory_space<vmem>>, vector<32x32xf32>
    %cst = arith.constant dense<0.000000e+00> : vector<8x32xf32>
    %3 = tpu.matmul %1, %2, %cst {dimension_numbers = #tpu.dot_dimension_numbers<[1], [0], [0], [1], [0, 0, 1, 1], [], []>} : vector<8x32xf32>, vector<32x32xf32>, vector<8x32xf32> -> vector<8x32xf32>
    %c0_4 = arith.constant 0 : index
    %c0_5 = arith.constant 0 : index
    %c0_6 = arith.constant 0 : index
    %4 = vector.load %arg6[%c0_4, %c0_5, %c0_6] : memref<1x8x32xf32, #tpu.memory_space<vmem>>, vector<1x8x32xf32>
    %5 = vector.shape_cast %4 : vector<1x8x32xf32> to vector<8x32xf32>
    %6 = vector.shape_cast %3 : vector<8x32xf32> to vector<1x8x32xf32>
    tpu.vector_store %arg6[%c0_4, %c0_5, %c0_6], %6 {strides = array<i32>} : memref<1x8x32xf32, #tpu.memory_space<vmem>>, vector<1x8x32xf32>,
    %c0_7 = arith.constant 0 : index
    %c0_8 = arith.constant 0 : index
    %7 = vector.load %arg5[%c0_7, %c0_8] : memref<32x32xf32, #tpu.memory_space<vmem>>, vector<32x32xf32>
    %cst_9 = arith.constant dense<0.000000e+00> : vector<8x32xf32>
    %8 = tpu.matmul %1, %7, %cst_9 {dimension_numbers = #tpu.dot_dimension_numbers<[1], [0], [0], [1], [0, 0, 1, 1], [], []>} : vector<8x32xf32>, vector<32x32xf32>, vector<8x32xf32> -> vector<8x32xf32>
    %c0_10 = arith.constant 0 : index
    %c0_11 = arith.constant 0 : index
    %c0_12 = arith.constant 0 : index
    %9 = vector.load %arg7[%c0_10, %c0_11, %c0_12] : memref<1x8x32xf32, #tpu.memory_space<vmem>>, vector<1x8x32xf32>
    %10 = vector.shape_cast %9 : vector<1x8x32xf32> to vector<8x32xf32>
    %11 = vector.shape_cast %8 : vector<8x32xf32> to vector<1x8x32xf32>
    tpu.vector_store %arg7[%c0_10, %c0_11, %c0_12], %11 {strides = array<i32>} : memref<1x8x32xf32, #tpu.memory_space<vmem>>, vector<1x8x32xf32>,
    return
  }
  func.func @transform_0(%arg0: i32, %arg1: i32, %arg2: i32) -> (i32, i32, i32) {
    %c0_i32 = arith.constant 0 : i32
    %c0_i32_0 = arith.constant 0 : i32
    return %arg0, %arg2, %c0_i32 : i32, i32, i32
  }
  func.func @transform_1(%arg0: i32, %arg1: i32, %arg2: i32) -> (i32, i32) {
    %c0_i32 = arith.constant 0 : i32
    %c0_i32_0 = arith.constant 0 : i32
    return %c0_i32, %arg1 : i32, i32
  }
  func.func @transform_2(%arg0: i32, %arg1: i32, %arg2: i32) -> (i32, i32) {
    %c0_i32 = arith.constant 0 : i32
    %c0_i32_0 = arith.constant 0 : i32
    return %c0_i32, %arg1 : i32, i32
  }
  func.func @transform_3(%arg0: i32, %arg1: i32, %arg2: i32) -> (i32, i32, i32) {
    %c0_i32 = arith.constant 0 : i32
    return %arg0, %arg2, %arg1 : i32, i32, i32
  }
  func.func @transform_4(%arg0: i32, %arg1: i32, %arg2: i32) -> (i32, i32, i32) {
    %c0_i32 = arith.constant 0 : i32
    return %arg0, %arg2, %arg1 : i32, i32, i32
  }
}

</mosaic_0001>

<bundles_post_ra>
// kernel: tpu_custom_call.1
= control target key start
LH: loop header
LB: loop body
LE: loop exit
PB: predicated region body
PF: predicated region fallthrough
CT: control target
= control target key end

     0   :  { %10 = vsyncpa [#allocation3], 0  ;;  %s1317_s0 = inlined_call_operand.hbm [shape: f32[2,8,32], index: 0, kind: input, shape index: {}]   ;;  %s1318_s1 = inlined_call_operand.hbm [shape: f32[32,32], index: 1, kind: input, shape index: {}]   ;;  %s1319_s2 = inlined_call_operand.hbm [shape: f32[32,32], index: 2, kind: input, shape index: {}]   ;;  %s1320_s3 = inlined_call_operand.hbm [shape: f32[2,8,32], index: 3, kind: output, shape index: {0}]   ;;  %s1321_s4 = inlined_call_operand.hbm [shape: f32[2,8,32], index: 4, kind: output, shape index: {1}]  }
   0x1   :  { %12 = vsyncpa [#allocation3 + $0x1], 0 }
   0x2   :  { %13 = vsyncpa [#allocation6], 0 }
   0x3   :  { %14 = vsyncpa [#allocation4], 0 }
   0x4   :  { %16 = vsyncpa [#allocation4 + $0x1], 0 }
   0x5   :  { %17 = vsyncpa [#allocation10], 0 }
   0x6   :  { %19 = vsyncpa [#allocation10 + $0x1], 0  ;;  %s1029_s15 = smov 0   ;;  %s1031_s16 = smov 0  }
   0x7   :  { %s1033_s17 = smov 0   ;;  %s1035_s18 = smov 0  }
   0x8   :  { %s1037_s19 = smov 0   ;;  %s1039_s20 = smov 0  }
   0x9 LB: > { %s629_s21 = sadd.s32 4294967295, %s992_s20   ;;  %s630_s22 = sadd.s32 4294967294, %s992_s20   ;;  %s992_s20 = sphi %s1039_s20, %s25_s20   ;;  %s988_s19 = sphi %s1037_s19, %s1343_s19   ;;  %s984_s18 = sphi %s1035_s18, %s1342_s18   ;;  %s980_s17 = sphi %s1033_s17, %s1341_s17   ;;  %s976_s16 = sphi %s1031_s16, %s1340_s16   ;;  %s972_s15 = sphi %s1029_s15, %s1339_s15  }
   0xa   : > { %p66_p0 = scmp.ne.s32.totalorder %s976_s16, %s972_s15  ;;  %p1063_p1 = scmp.eq.s32.totalorder %s629_s21, 0 }
   0xb   : > { %p1067_p2 = scmp.eq.s32.totalorder %s629_s21, 1  ;;  %p152_p3 = scmp.eq.s32.totalorder %s630_s22, 1 }
   0xc   : > { %s1326_s23 = scalar_select %p1063_p1, 1, 0 }
   0xd   : > { %p1073_p4 = por %p1063_p1, %p66_p0  ;;  %p631_p5 = scmp.ge.s32.totalorder %s992_s20, 1 }
   0xe   : > { %p1078_p6 = por %p152_p3, %p66_p0  ;;  %p189_p7 = scmp.lt.s32.totalorder %s992_s20, 3 }
   0xf   : > { %s1328_s25 = scalar_select %p1073_p4, 1, 0 }
  0x10   : > { %s1329_s26 = scalar_select %p1078_p6, 1, 0 }
  0x11   : > { %p1083_p8 = pnand %p631_p5, %p189_p7  ;;  %s994_s28 = smov [#allocation5]  }
  0x12   : > { %s203_s29 = sshll.u32 %s994_s28, 4  ;;  %s995_s5 = smov [#allocation7]   ;;  %s1087_s29 = int_to_ptr.vmem [resolvable:$true] %s203_s29 }
  0x13   : > { %p709_p9 = pneg %p1083_p8  ;;  %s218_s6 = sshll.u32 %s995_s5, 4  ;;  %s1098_s6 = int_to_ptr.vmem [resolvable:$true] %s218_s6 }
  0x14   : > { %s788_s9 = scalar_lea.hbm %s1318_s1, 512 }
  0x15   : > { %p1094_p11 = pnand %p709_p9, %p1063_p1  ;;  %p789_p12 = scmp.ne.s32.totalorder %s1318_s1, %s788_s9 }
  0x16   : > { %p795_p5 = scmp.lt.u32.totalorder %s788_s9, %s1318_s1 }
  0x17   : > { %p790_p13 = pneg %p1094_p11 }
  0x19   : > { %p791_p0 = pnand %p790_p13, %p789_p12 }
  0x1b   : > { %p792_p3 = pneg %p791_p0 }
  0x1d   : > { %p797_p7 = pnand %p795_p5, %p792_p3 }
  0x1f   : > { %800 = shalt.err (!%p797_p7)
}
  0x20   : > { %s801_s14 = scalar_lea.vmem %s1087_s29, 512  ;;  %p809_p1 = scmp.lt.s32.totalorder %s1087_s29, %s1087_s29 }
  0x21   : > { %p802_p9 = scmp.ne.s32.totalorder %s1087_s29, %s801_s14  ;;  %p810_p12 = scmp.lt.s32.totalorder %s801_s14, %s801_s14 }
  0x23   : > { %p804_p10 = pnand %p802_p9, %p790_p13  ;;  %p811_p0 = por %p810_p12, %p809_p1 }
  0x25   : > { %p805_p6 = pneg %p804_p10 }
  0x27   : > { %p812_p4 = pnand %p811_p0, %p805_p6 }
  0x29   : > { %815 = shalt.err (!%p812_p4)
}
  0x2a   : > { %s996_s21 = smov 128   ;;  %s997_s22 = smov 8  }
  0x2b   : > { %712 = dma.hbm_to_vmem [thread:$0]  (!%p1094_p11), %s1318_s1, 512, %s1087_s29, [#allocation6], %s996_s21, %s996_s21, %s997_s22  }
  0x2c   : > { %s816_s9 = scalar_lea.hbm %s1319_s2, 512 }
  0x2d   : > { %p817_p1 = scmp.ne.s32.totalorder %s1319_s2, %s816_s9  ;;  %p823_p10 = scmp.lt.u32.totalorder %s816_s9, %s1319_s2 }
  0x2f   : > { %p819_p4 = pnand %p817_p1, %p790_p13 }
  0x31   : > { %p820_p6 = pneg %p819_p4 }
  0x33   : > { %p825_p3 = pnand %p823_p10, %p820_p6 }
  0x35   : > { %828 = shalt.err (!%p825_p3)
}
  0x36   : > { %s829_s29 = scalar_lea.vmem %s1098_s6, 512  ;;  %p837_p12 = scmp.lt.s32.totalorder %s1098_s6, %s1098_s6 }
  0x37   : > { %p830_p5 = scmp.ne.s32.totalorder %s1098_s6, %s829_s29  ;;  %p838_p0 = scmp.lt.s32.totalorder %s829_s29, %s829_s29 }
  0x39   : > { %p832_p7 = pnand %p830_p5, %p790_p13  ;;  %p839_p1 = por %p838_p0, %p837_p12 }
  0x3b   : > { %p833_p9 = pneg %p832_p7 }
  0x3d   : > { %p840_p4 = pnand %p839_p1, %p833_p9 }
  0x3f   : > { %843 = shalt.err (!%p840_p4)
}
  0x40   : > { %715 = dma.hbm_to_vmem [thread:$0]  (!%p1094_p11), %s1319_s2, 512, %s1098_s6, [#allocation6], %s996_s21, %s996_s21, %s997_s22  }
  0x41   : > { %s44_s5 = sadd.s32 1, %s988_s19  ;;  %s53_s7 = sadd.s32 1, %s980_s17 }
  0x42   : > { %p46_p13 = scmp.ge.s32.totalorder %s44_s5, 2  ;;  %p60_p6 = scmp.ne.s32.totalorder %s980_s17, %s976_s16 }
  0x43   : > { %p61_p10 = scmp.eq.s32.totalorder %s992_s20, 0  ;;  %p729_p3 = scmp.lt.s32.totalorder %s992_s20, 2 }
  0x44   : > { %s1345_s5 = smov (%p46_p13, %s44_s5), 0  ;;  %p1162_p7 = por %p1067_p2, %p60_p6 }
  0x45   : > { %p62_p5 = por %p61_p10, %p60_p6  ;;  %s48_s8 = ssub.s32 %s988_s19, %s1345_s5 }
  0x46   : > { %s1332_s30 = scalar_select %p1162_p7, 1, 0 }
  0x47   : > { %s232_s9 = sand.u32 1, %s980_s17   ;;  %p51_p9 = scmp.eq.s32.totalorder %s48_s8, 0 }
  0x48   : > { %s635_s6 = sshll.u32 %s232_s9, 3  ;;  %s636_s21 = sshll.u32 %s988_s19, 7 }
  0x49   : > { %s1171_s22 = scalar_select %p51_p9, %s980_s17, %s53_s7  }
  0x4a   : > { %s1176_s12 = scalar_lea.hbm %s1317_s0, %s636_s21  ;;  %s236_s24 = scalar_lea.vmem [#allocation2], %s635_s6 }
  0x4b   : > { %s244_s13 = sshll.u32 %s236_s24, 4  ;;  %p1180_p2 = pnand %p729_p3, %p62_p5  ;;  %s1184_s13 = int_to_ptr.vmem [resolvable:$true] %s244_s13 }
  0x4c   : > { %s233_s14 = scalar_lea.sflag [#allocation3], %s232_s9  ;;  %s844_s28 = scalar_lea.hbm %s1176_s12, 128 }
  0x4d   : > { %p845_p11 = scmp.ne.s32.totalorder %s1176_s12, %s844_s28  ;;  %p846_p12 = pneg %p1180_p2 }
  0x4e   : > { %s849_s6 = scalar_lea.hbm %s1317_s0, 256  ;;  %p850_p4 = scmp.lt.u32.totalorder %s1176_s12, %s1317_s0 }
  0x4f   : > { %p847_p0 = pnand %p846_p12, %p845_p11  ;;  %p851_p13 = scmp.lt.u32.totalorder %s849_s6, %s844_s28 }
  0x50   : > { %p853_p10 = scmp.lt.u32.totalorder %s844_s28, %s1176_s12 }
  0x51   : > { %p848_p1 = pneg %p847_p0  ;;  %p852_p6 = por %p851_p13, %p850_p4 }
  0x53   : > { %p854_p3 = por %p853_p10, %p852_p6 }
  0x55   : > { %p855_p5 = pnand %p854_p3, %p848_p1 }
  0x57   : > { %858 = shalt.err (!%p855_p5)
}
  0x58   : > { %s859_s9 = scalar_lea.vmem %s1184_s13, 128  ;;  %s998_s11 = smov [#allocation2]  }
  0x59   : > { %p860_p9 = scmp.ne.s32.totalorder %s1184_s13, %s859_s9  ;;  %s864_s24 = sshll.u32 %s998_s11, 4  ;;  %s865_s24 = int_to_ptr.vmem [resolvable:$false] %s864_s24 }
  0x5a   : > { %s866_s7 = scalar_lea.vmem %s865_s24, 256  ;;  %p867_p7 = scmp.lt.s32.totalorder %s1184_s13, %s865_s24 }
  0x5b   : > { %p862_p11 = pnand %p860_p9, %p846_p12  ;;  %p868_p4 = scmp.lt.s32.totalorder %s866_s7, %s859_s9 }
  0x5d   : > { %p863_p0 = pneg %p862_p11  ;;  %p869_p13 = por %p868_p4, %p867_p7 }
  0x5f   : > { %p870_p6 = pnand %p869_p13, %p863_p0 }
  0x61   : > { %873 = shalt.err (!%p870_p6)
}
  0x62   : > { %719 = dma.hbm_to_vmem [thread:$0]  (!%p1180_p2), %s1176_s12, 128, %s1184_s13, %s233_s14  }
  0x63   : > { %253 = sbr.rel (%p1083_p8) target bundleno = 371 (0x173), region = 32  ;;  %s1214_s28 = sand.u32 (!%p1083_p8), 1, %s976_s16  }
  0x64   : > { %s1217_s8 = sshll.u32 (!%p1083_p8), %s1214_s28, 3  ;;  %s256_s6 = scalar_lea.sflag (!%p1083_p8), [#allocation3], %s1214_s28 }
  0x65   : > { %s259_s21 = scalar_lea.vmem (!%p1083_p8), [#allocation2], %s1217_s8  ;;  %p1334_p7 = scmp.ne.s32.totalorder (!%p1083_p8), %s1328_s25, 0 }
  0x6a   : > { %955 = dma.done.wait (%p1334_p7), %s256_s6, 128  }
  0x6b   : > { %957 = vsyncadd (%p1334_p7), %s256_s6, 4294967168  ;;  %p1335_p2 = scmp.ne.s32.totalorder %s1326_s23, 0 }
  0x6d   : > { %959 = dma.done.wait (%p1335_p2), [#allocation6], 1024  }
  0x6e   : > { %961 = vsyncadd (%p1335_p2), [#allocation6], 4294966272  ;;  %v999_v0 = vmov 0.0|0.0   ;;  %vm1000_vm0 = vmmov 0   ;;  %v1001_v1 = vmov 0.0   ;;  %v298_v2 = vld [vmem:[#allocation5] sm:$0xff] }
  0x6f   : > { %683 = vmatprep.subr.bf16.mxu0 %v999_v0  ;;  %689 = vmatprep.subr.bf16.mxu1 %v999_v0  ;;  %v299_v3 = vld [vmem:[#allocation5 + $0x8] sm:$0xff]  ;;  %v377_v4 = vld [vmem:[#allocation7] sm:$0xff]  ;;  %v300_v7 = vld [vmem:[#allocation5 + $0x10] sm:$0xff]  ;;  %vm302_vm1 = vcmask 261120   ;;  %s647_s23 = sshll.u32 %s984_s18, 7  ;;  %s289_s25 = scalar_lea.vmem [#allocation8], %s1217_s8 }
  0x70   : > { %669 = vmatprep.mubr.msk.f32.mxu0 %vm1000_vm0, %v1001_v1  ;;  %680 = vmatprep.mubr.msk.f32.mxu1 %vm1000_vm0, %v1001_v1  ;;  %v684_v5 = vpack.c.bf16 %v299_v3, %v298_v2  ;;  %v378_v6 = vld [vmem:[#allocation7 + $0x8] sm:$0xff]  ;;  %v301_v8 = vld [vmem:[#allocation5 + $0x18] sm:$0xff]  ;;  %v379_v10 = vld [vmem:[#allocation7 + $0x10] sm:$0xff]  ;;  %s473_s27 = sshll.u32 %s289_s25, 4  ;;  %s296_s12 = scalar_lea.vmem [#allocation9], %s1217_s8  ;;  %s1239_s27 = int_to_ptr.vmem [resolvable:$true] %s473_s27 }
  0x71   : > { %v690_v9 = vpack.c.bf16 %v378_v6, %v377_v4  ;;  %v380_v11 = vld [vmem:[#allocation7 + $0x18] sm:$0xff]  ;;  %v687_v12 = vpack.c.bf16 %v301_v8, %v300_v7  ;;  %s488_s13 = sshll.u32 %s296_s12, 4  ;;  %s1237_s10 = scalar_lea.hbm %s1320_s3, %s647_s23  ;;  %s1246_s13 = int_to_ptr.vmem [resolvable:$true] %s488_s13 }
  0x72   : > { %685 = vmatpush3.bf16.msra.mxu0 %v684_v5  ;;  %v693_v13 = vpack.c.bf16 %v380_v11, %v379_v10  ;;  %v297_v14 = vld [vmem:[%s259_s21] sm:$0xff]  ;;  %s1244_s24 = scalar_lea.hbm %s1321_s4, %s647_s23  ;;  %s453_s18 = scalar_lea.sflag [#allocation4], %s1214_s28 }
  0x73   : > { %691 = vmatpush3.bf16.msra.mxu1 %v690_v9  ;;  %686 = vmatprep.subr.bf16.mxu0 %v999_v0  ;;  %s874_s7 = scalar_lea.vmem %s1239_s27, 128  ;;  %p1336_p12 = scmp.ne.s32.totalorder %s1332_s30, 0 }
  0x74   : > { %692 = vmatprep.subr.bf16.mxu1 %v999_v0  ;;  %p875_p8 = scmp.ne.s32.totalorder %s1239_s27, %s874_s7  ;;  %s1002_s8 = smov [#allocation8]  }
  0x75   : > { %s878_s6 = sshll.u32 %s1002_s8, 4  ;;  %s879_s6 = int_to_ptr.vmem [resolvable:$false] %s878_s6 }
  0x76   : > { %688 = vmatpush3.bf16.msra.mxu0 %v687_v12  ;;  %p876_p1 = pnand %p875_p8, %p1336_p12  ;;  %s880_s21 = scalar_lea.vmem %s879_s6, 256 }
  0x77   : > { %694 = vmatpush3.bf16.msra.mxu1 %v693_v13  ;;  %p881_p3 = scmp.lt.s32.totalorder %s1239_s27, %s879_s6  ;;  %p882_p5 = scmp.lt.s32.totalorder %s880_s21, %s874_s7 }
  0x78   : > { %p877_p10 = pneg %p876_p1 }
  0x79   : > { %670 = vmatmul.mubr.msk.f32.vlgmr.msra.gmra.mrb[0].mxu0 %vm302_vm1, %v297_v14  ;;  %p883_p9 = por %p882_p5, %p881_p3 }
  0x7a   : > { %681 = vmatmul.mubr.msk.f32.vlgmr.msra.gmra.mrb[0].mxu1 %vm302_vm1, %v297_v14 }
  0x7b   : > { %p884_p11 = pnand %p883_p9, %p877_p10 }
 0x14c   : > { %v372_v15 = vpop.f32.mrb[0].mxu0 }
 0x14d   : > { %376 = vst.msk [vmem:[%s289_s25] sm:$0xff] %vm302_vm1, %v372_v15  ;;  %v447_v16 = vpop.f32.mrb[0].mxu1  ;;  %v671_v17 = vpop.f32.mrb[1].mxu0 }
 0x14e   : > { %451 = vst.msk [vmem:[%s296_s12] sm:$0xff] %vm302_vm1, %v447_v16  ;;  %v682_v18 = vpop.f32.mrb[1].mxu1 }
 0x14f   : > { %887 = shalt.err (!%p884_p11)
}
 0x150   : > { %s888_s23 = scalar_lea.hbm %s1237_s10, 128  ;;  %s892_s29 = scalar_lea.hbm %s1320_s3, 256 }
 0x151   : > { %p889_p0 = scmp.ne.s32.totalorder %s1237_s10, %s888_s23  ;;  %p893_p6 = scmp.lt.u32.totalorder %s1237_s10, %s1320_s3 }
 0x152   : > { %p894_p7 = scmp.lt.u32.totalorder %s892_s29, %s888_s23  ;;  %p896_p8 = scmp.lt.u32.totalorder %s888_s23, %s1237_s10 }
 0x153   : > { %p890_p4 = pnand %p889_p0, %p1336_p12 }
 0x154   : > { %p895_p2 = por %p894_p7, %p893_p6 }
 0x155   : > { %p891_p13 = pneg %p890_p4 }
 0x156   : > { %p897_p1 = por %p896_p8, %p895_p2 }
 0x158   : > { %p898_p10 = pnand %p897_p1, %p891_p13 }
 0x15a   : > { %901 = shalt.err (!%p898_p10)
}
 0x15b   : > { %705 = dma.vmem_to_hbm [thread:$0]  (%p1336_p12), %s1239_s27, 128, %s1237_s10, %s453_s18  }
 0x15c   : > { %s458_s11 = scalar_lea.sflag [#allocation10], %s1214_s28  ;;  %s902_s7 = scalar_lea.vmem %s1246_s13, 128 }
 0x15d   : > { %p903_p3 = scmp.ne.s32.totalorder %s1246_s13, %s902_s7  ;;  %s1003_s8 = smov [#allocation9]  }
 0x15e   : > { %s906_s6 = sshll.u32 %s1003_s8, 4  ;;  %s907_s6 = int_to_ptr.vmem [resolvable:$false] %s906_s6 }
 0x15f   : > { %p904_p5 = pnand %p903_p3, %p1336_p12  ;;  %s908_s21 = scalar_lea.vmem %s907_s6, 256 }
 0x160   : > { %p909_p11 = scmp.lt.s32.totalorder %s1246_s13, %s907_s6  ;;  %p910_p0 = scmp.lt.s32.totalorder %s908_s21, %s902_s7 }
 0x161   : > { %p905_p9 = pneg %p904_p5 }
 0x162   : > { %p911_p4 = por %p910_p0, %p909_p11 }
 0x164   : > { %p912_p13 = pnand %p911_p4, %p905_p9 }
 0x166   : > { %915 = shalt.err (!%p912_p13)
}
 0x167   : > { %s916_s28 = scalar_lea.hbm %s1244_s24, 128  ;;  %s920_s18 = scalar_lea.hbm %s1321_s4, 256 }
 0x168   : > { %p917_p6 = scmp.ne.s32.totalorder %s1244_s24, %s916_s28  ;;  %p921_p8 = scmp.lt.u32.totalorder %s1244_s24, %s1321_s4 }
 0x169   : > { %p922_p1 = scmp.lt.u32.totalorder %s920_s18, %s916_s28  ;;  %p924_p3 = scmp.lt.u32.totalorder %s916_s28, %s1244_s24 }
 0x16a   : > { %p918_p7 = pnand %p917_p6, %p1336_p12 }
 0x16b   : > { %p923_p10 = por %p922_p1, %p921_p8 }
 0x16c   : > { %p919_p2 = pneg %p918_p7 }
 0x16d   : > { %p925_p5 = por %p924_p3, %p923_p10 }
 0x16f   : > { %p926_p9 = pnand %p925_p5, %p919_p2 }
 0x171   : > { %929 = shalt.err (!%p926_p9)
}
 0x172   : > { %706 = dma.vmem_to_hbm [thread:$0]  (%p1336_p12), %s1246_s13, 128, %s1244_s24, %s458_s11  }
 0x173 PF: > { %s500_s12 = sand.u32 1, %s972_s15   ;;  %p1337_p11 = scmp.ne.s32.totalorder %s1329_s26, 0 }
 0x174   : > { %p1338_p0 = scmp.ge.s32.totalorder %s992_s20, 2  ;;  %s501_s29 = scalar_lea.sflag [#allocation4], %s500_s12 }
 0x176   : > { %p721_p4 = pnand %p1338_p0, %p1337_p11 }
 0x178   : > { %963 = dma.done.wait (!%p721_p4), %s501_s29, 128  }
 0x179   : > { %965 = vsyncadd (!%p721_p4), %s501_s29, 4294967168  ;;  %s510_s14 = scalar_lea.sflag [#allocation10], %s500_s12 }
 0x17a   : > { %967 = dma.done.wait (!%p721_p4), %s510_s14, 128  }
 0x17b   : > { %969 = vsyncadd (!%p721_p4), %s510_s14, 4294967168  ;;  %s25_s20 = sadd.s32 1, %s992_s20   ;;  %s1339_s15 = smov %s976_s16 }
 0x17c   : > { %p22_p13 = scmp.ge.s32.totalorder %s25_s20, 4   ;;  %s1340_s16 = smov %s980_s17 }
 0x17d   : > { %s1341_s17 = smov %s1171_s22  ;;  %s1342_s18 = smov %s988_s19 }
 0x17e   : > { %s1343_s19 = smov %s1345_s5  ;;  %24 = sbr.rel (!%p22_p13) target bundleno = 9 (0x9), region = 104 }
 0x185   :  { %515 = vsyncpa [#allocation3], 1 }
 0x186   :  { %517 = vsyncpa [#allocation3 + $0x1], 1 }
 0x187   :  { %518 = vsyncpa [#allocation6], 1 }
 0x188   :  { %519 = vsyncpa [#allocation4], 1 }
 0x189   :  { %521 = vsyncpa [#allocation4 + $0x1], 1 }
 0x18a   :  { %522 = vsyncpa [#allocation10], 1 }
 0x18b   :  { %524 = vsyncpa [#allocation10 + $0x1], 1 }

</bundles_post_ra>
